<compile_context>
chip_gen: v6e
topology: v6e:2x2x1
jax: 0.10.0
libtpu: 0.0.40
codegen_flags: <defaults>
</compile_context>

<pallas_src>
import jax
import jax.numpy as jnp
from jax.experimental import pallas as pl
from jax.experimental.pallas import tpu as pltpu


def mlp_kernel(x_ref, w1_ref, b1_ref, w2_ref, b2_ref, w3_ref, b3_ref, o_ref):
    # Feed the MXU bf16 operands; accumulate / element-wise in f32.
    x = x_ref[...].astype(jnp.bfloat16)

    # fc1 + ReLU
    h1 = jnp.dot(x, w1_ref[...], preferred_element_type=jnp.float32) + b1_ref[...]
    h1 = jnp.maximum(h1, 0.0)

    # fc2 + ReLU
    h2 = jnp.dot(h1.astype(jnp.bfloat16), w2_ref[...],
                 preferred_element_type=jnp.float32) + b2_ref[...]
    h2 = jnp.maximum(h2, 0.0)

    # fc3 (output width 1): produce a LANE-DENSE (1, tile_b) row,
    # z[0, r] = w3 . h2[r, :]  ==  (1, H2) contracted with (tile_b, H2).
    z = jax.lax.dot_general(
        w3_ref[...], h2,
        dimension_numbers=(((1,), (1,)), ((), ())),
        preferred_element_type=jnp.float32,
    ) + b3_ref[0, 0]
    o_ref[...] = jax.nn.sigmoid(z).astype(o_ref.dtype)


def _round_up(n, m):
    return ((n + m - 1) // m) * m


def mlp_forward(x, w1, b1, w2, b2, w3, b3, *, tile_b=4096):
    """x: (B, D_in); w_i: (in_i, out_i); b_i: (1, out_i). Returns (B, 1) f32."""
    B, d_in = x.shape
    h1_dim, h2_dim = w1.shape[1], w2.shape[1]
    d_out = w3.shape[1]

    # ---- batch tiling -------------------------------------------------------
    # tile_b is a multiple of 128 (sublane constraint on the x block AND lane
    # constraint on the lane-dense output block).
    tile_b = max(128, _round_up(int(tile_b), 128))
    num_tiles = pl.cdiv(B, tile_b)
    # v7x megacore: keep >= 2 grid steps when the batch is big enough to split.
    if num_tiles < 2 and B > 256:
        tile_b = max(128, _round_up(pl.cdiv(B, 2), 128))
        num_tiles = pl.cdiv(B, tile_b)

    if num_tiles == 1:
        # Single block that exactly matches the full array extents (no masking,
        # works for any B, even non-multiples of 8).
        rows = B
    else:
        rows = tile_b  # multiple of 128; ragged last block handled by edge masking

    out_width = num_tiles * rows  # padded output allocation (sliced to B below)

    # ---- operand prep -------------------------------------------------------
    # bf16 weights for the MXU; f32 biases; fc3 weight as a (1, H2) f32 row;
    # fc3 bias as an SMEM scalar.
    w1_b = w1.astype(jnp.bfloat16)
    w2_b = w2.astype(jnp.bfloat16)
    w3_row = w3.T.astype(jnp.float32)           # (1, h2_dim)
    b3_s = b3.reshape(1, 1).astype(jnp.float32)
    b1_f = b1.astype(jnp.float32)
    b2_f = b2.astype(jnp.float32)

    flops = 2 * out_width * (d_in * h1_dim + h1_dim * h2_dim + h2_dim * d_out)
    bytes_accessed = (
        x.size * x.dtype.itemsize
        + w1_b.size * 2 + w2_b.size * 2
        + b1_f.size * 4 + b2_f.size * 4
        + w3_row.size * 4 + 4
        + out_width * 4
    )
    cost = pl.CostEstimate(flops=flops,
                           transcendentals=out_width,  # sigmoid exp
                           bytes_accessed=bytes_accessed)

    const2d = lambda i: (0, 0)

    out = pl.pallas_call(
        mlp_kernel,
        out_shape=jax.ShapeDtypeStruct((1, out_width), jnp.float32),
        grid=(num_tiles,),
        in_specs=[
            pl.BlockSpec((rows, d_in), lambda i: (i, 0)),          # x: batch-tiled
            pl.BlockSpec(w1_b.shape, const2d),                      # weights stay
            pl.BlockSpec(b1_f.shape, const2d),                      # VMEM-resident
            pl.BlockSpec(w2_b.shape, const2d),
            pl.BlockSpec(b2_f.shape, const2d),
            pl.BlockSpec(w3_row.shape, const2d),
            pl.BlockSpec(memory_space=pltpu.MemorySpace.SMEM),      # b3 scalar
        ],
        # lane-dense (1, rows) output row per grid step
        out_specs=pl.BlockSpec((1, rows), lambda i: (0, i)),
        compiler_params=pltpu.CompilerParams(
            dimension_semantics=("parallel",),
        ),
        cost_estimate=cost,
    )(x, w1_b, b1_f, w2_b, b2_f, w3_row, b3_s)

    # (1, out_width) row -> (B, 1) column; padded tail (if any) is dropped.
    return out.reshape(-1)[:B].reshape(B, d_out)


def init_params(key, input_dim, hidden_dim1, hidden_dim2, output_dim):
    """Deterministic init matching nn.Linear shapes (weights stored transposed)."""
    ks = jax.random.split(key, 6)

    def linear(kw, kb, fan_in, fan_out):
        bound = 1.0 / jnp.sqrt(fan_in)
        # torch stores W as (out, in); we keep the transpose (in, out) for the kernel.
        w = jax.random.uniform(kw, (fan_in, fan_out), jnp.float32, -bound, bound)
        b = jax.random.uniform(kb, (1, fan_out), jnp.float32, -bound, bound)
        return w, b

    w1, b1 = linear(ks[0], ks[1], input_dim, hidden_dim1)
    w2, b2 = linear(ks[2], ks[3], hidden_dim1, hidden_dim2)
    w3, b3 = linear(ks[4], ks[5], hidden_dim2, output_dim)
    return w1, b1, w2, b2, w3, b3


def _reference(x, params):
    w1, b1, w2, b2, w3, b3 = params
    return jax.nn.sigmoid(
        jnp.maximum(jnp.maximum(x @ w1 + b1, 0.0) @ w2 + b2, 0.0) @ w3 + b3
    )


if __name__ == "__main__":
    # Shapes consistent with the module: input_dim=16, hidden_dim1=64,
    # hidden_dim2=32, output_dim=1.
    input_dim, hidden_dim1, hidden_dim2, output_dim = 16, 64, 32, 1

    key = jax.random.PRNGKey(0)
    k_x, k_x2, k_x3, k_p = jax.random.split(key, 4)
    params = init_params(k_p, input_dim, hidden_dim1, hidden_dim2, output_dim)

    # Case 1: batch=8 -> single full-extent block (no masking).
    x = jax.random.normal(k_x, (8, input_dim), dtype=jnp.float32)
    out = jax.block_until_ready(mlp_forward(x, *params))
    ref = _reference(x, params)
    assert out.shape == (8, output_dim)
    # bf16 MXU inputs -> tolerance relaxed vs. the pure-f32 reference.
    assert jnp.allclose(out, ref, atol=2e-2, rtol=2e-2)

    # Case 2: batch=20 -> still single block, non-multiple-of-8 rows.
    x2 = jax.random.normal(k_x2, (20, input_dim), dtype=jnp.float32)
    out2 = jax.block_until_ready(mlp_forward(x2, *params))
    ref2 = _reference(x2, params)
    assert out2.shape == (20, output_dim)
    assert jnp.allclose(out2, ref2, atol=2e-2, rtol=2e-2)

    # Case 3: batch=300 with tile_b=128 -> multi-step grid + ragged edge block
    # (no wrapper-side padding of x).
    x3 = jax.random.normal(k_x3, (300, input_dim), dtype=jnp.float32)
    out3 = jax.block_until_ready(mlp_forward(x3, *params, tile_b=128))
    ref3 = _reference(x3, params)
    assert out3.shape == (300, output_dim)
    assert jnp.allclose(out3, ref3, atol=2e-2, rtol=2e-2)

    print("KERNEL_OK")
</pallas_src>

<mosaic_0001>
module attributes {stable_mosaic.version = 11 : i64} {
  func.func @mlp_kernel(%arg0: i32, %arg1: memref<8x16xf32, #tpu.memory_space<vmem>>, %arg2: memref<16x64xbf16, #tpu.memory_space<vmem>>, %arg3: memref<1x64xf32, #tpu.memory_space<vmem>>, %arg4: memref<64x32xbf16, #tpu.memory_space<vmem>>, %arg5: memref<1x32xf32, #tpu.memory_space<vmem>>, %arg6: memref<1x32xf32, #tpu.memory_space<vmem>>, %arg7: memref<1x1xf32, #tpu.memory_space<smem>>, %arg8: memref<1x8xf32, #tpu.memory_space<vmem>>) attributes {dimension_semantics = [#tpu.dimension_semantics<parallel>], iteration_bounds = array<i64: 1>, scalar_prefetch = 0 : i64, scratch_operands = 0 : i64, tpu.core_type = #tpu.core_type<tc>, window_params = [{transform_indices = @transform_0, window_bounds = array<i64: 8, 16>}, {pipeline_mode = #tpu.pipeline_mode<synchronous>, transform_indices = @transform_1, window_bounds = array<i64: 16, 64>}, {pipeline_mode = #tpu.pipeline_mode<synchronous>, transform_indices = @transform_2, window_bounds = array<i64: 1, 64>}, {pipeline_mode = #tpu.pipeline_mode<synchronous>, transform_indices = @transform_3, window_bounds = array<i64: 64, 32>}, {pipeline_mode = #tpu.pipeline_mode<synchronous>, transform_indices = @transform_4, window_bounds = array<i64: 1, 32>}, {pipeline_mode = #tpu.pipeline_mode<synchronous>, transform_indices = @transform_5, window_bounds = array<i64: 1, 32>}, {transform_indices = @transform_6, window_bounds = array<i64: 1, 1>}, {transform_indices = @transform_7, window_bounds = array<i64: 1, 8>}]} {
    %c0 = arith.constant 0 : index
    %c0_0 = arith.constant 0 : index
    %0 = vector.load %arg1[%c0, %c0_0] : memref<8x16xf32, #tpu.memory_space<vmem>>, vector<8x16xf32>
    %1 = arith.truncf %0 : vector<8x16xf32> to vector<8x16xbf16>
    %c0_1 = arith.constant 0 : index
    %c0_2 = arith.constant 0 : index
    %2 = vector.load %arg2[%c0_1, %c0_2] : memref<16x64xbf16, #tpu.memory_space<vmem>>, vector<16x64xbf16>
    %cst = arith.constant dense<0.000000e+00> : vector<8x64xf32>
    %3 = tpu.matmul %1, %2, %cst {dimension_numbers = #tpu.dot_dimension_numbers<[1], [0], [0], [1], [0, 0, 1, 1], [], []>} : vector<8x16xbf16>, vector<16x64xbf16>, vector<8x64xf32> -> vector<8x64xf32>
    %c0_3 = arith.constant 0 : index
    %c0_4 = arith.constant 0 : index
    %4 = vector.load %arg3[%c0_3, %c0_4] : memref<1x64xf32, #tpu.memory_space<vmem>>, vector<1x64xf32>
    %5 = vector.broadcast %4 : vector<1x64xf32> to vector<8x64xf32>
    %6 = arith.addf %3, %5 : vector<8x64xf32>
    %cst_5 = arith.constant 0.000000e+00 : f32
    %7 = vector.broadcast %cst_5 : f32 to vector<8x64xf32>
    %8 = arith.maximumf %6, %7 : vector<8x64xf32>
    %9 = arith.truncf %8 : vector<8x64xf32> to vector<8x64xbf16>
    %c0_6 = arith.constant 0 : index
    %c0_7 = arith.constant 0 : index
    %10 = vector.load %arg4[%c0_6, %c0_7] : memref<64x32xbf16, #tpu.memory_space<vmem>>, vector<64x32xbf16>
    %cst_8 = arith.constant dense<0.000000e+00> : vector<8x32xf32>
    %11 = tpu.matmul %9, %10, %cst_8 {dimension_numbers = #tpu.dot_dimension_numbers<[1], [0], [0], [1], [0, 0, 1, 1], [], []>} : vector<8x64xbf16>, vector<64x32xbf16>, vector<8x32xf32> -> vector<8x32xf32>
    %c0_9 = arith.constant 0 : index
    %c0_10 = arith.constant 0 : index
    %12 = vector.load %arg5[%c0_9, %c0_10] : memref<1x32xf32, #tpu.memory_space<vmem>>, vector<1x32xf32>
    %13 = vector.broadcast %12 : vector<1x32xf32> to vector<8x32xf32>
    %14 = arith.addf %11, %13 : vector<8x32xf32>
    %cst_11 = arith.constant 0.000000e+00 : f32
    %15 = vector.broadcast %cst_11 : f32 to vector<8x32xf32>
    %16 = arith.maximumf %14, %15 : vector<8x32xf32>
    %c0_12 = arith.constant 0 : index
    %c0_13 = arith.constant 0 : index
    %17 = vector.load %arg6[%c0_12, %c0_13] : memref<1x32xf32, #tpu.memory_space<vmem>>, vector<1x32xf32>
    %cst_14 = arith.constant dense<0.000000e+00> : vector<1x8xf32>
    %18 = tpu.matmul %17, %16, %cst_14 {dimension_numbers = #tpu.dot_dimension_numbers<[1], [1], [0], [0], [0, 0, 1, 0], [], []>} : vector<1x32xf32>, vector<8x32xf32>, vector<1x8xf32> -> vector<1x8xf32>
    %c0_15 = arith.constant 0 : index
    %c0_16 = arith.constant 0 : index
    %19 = memref.load %arg7[%c0_15, %c0_16] : memref<1x1xf32, #tpu.memory_space<smem>>
    %20 = vector.broadcast %19 : f32 to vector<1x8xf32>
    %21 = arith.addf %18, %20 : vector<1x8xf32>
    %22 = arith.negf %21 : vector<1x8xf32>
    %23 = math.exp %22 : vector<1x8xf32>
    %cst_17 = arith.constant 1.000000e+00 : f32
    %24 = vector.broadcast %cst_17 : f32 to vector<1x8xf32>
    %25 = arith.addf %24, %23 : vector<1x8xf32>
    %26 = arith.divf %24, %25 : vector<1x8xf32>
    %c0_18 = arith.constant 0 : index
    %c0_19 = arith.constant 0 : index
    %27 = vector.load %arg8[%c0_18, %c0_19] : memref<1x8xf32, #tpu.memory_space<vmem>>, vector<1x8xf32>
    tpu.vector_store %arg8[%c0_18, %c0_19], %26 {strides = array<i32>} : memref<1x8xf32, #tpu.memory_space<vmem>>, vector<1x8xf32>,
    return
  }
  func.func @transform_0(%arg0: i32) -> (i32, i32) {
    %c0_i32 = arith.constant 0 : i32
    %c0_i32_0 = arith.constant 0 : i32
    return %arg0, %c0_i32 : i32, i32
  }
  func.func @transform_1(%arg0: i32) -> (i32, i32) {
    %c0_i32 = arith.constant 0 : i32
    %c0_i32_0 = arith.constant 0 : i32
    %c0_i32_1 = arith.constant 0 : i32
    return %c0_i32, %c0_i32_0 : i32, i32
  }
  func.func @transform_2(%arg0: i32) -> (i32, i32) {
    %c0_i32 = arith.constant 0 : i32
    %c0_i32_0 = arith.constant 0 : i32
    %c0_i32_1 = arith.constant 0 : i32
    return %c0_i32, %c0_i32_0 : i32, i32
  }
  func.func @transform_3(%arg0: i32) -> (i32, i32) {
    %c0_i32 = arith.constant 0 : i32
    %c0_i32_0 = arith.constant 0 : i32
    %c0_i32_1 = arith.constant 0 : i32
    return %c0_i32, %c0_i32_0 : i32, i32
  }
  func.func @transform_4(%arg0: i32) -> (i32, i32) {
    %c0_i32 = arith.constant 0 : i32
    %c0_i32_0 = arith.constant 0 : i32
    %c0_i32_1 = arith.constant 0 : i32
    return %c0_i32, %c0_i32_0 : i32, i32
  }
  func.func @transform_5(%arg0: i32) -> (i32, i32) {
    %c0_i32 = arith.constant 0 : i32
    %c0_i32_0 = arith.constant 0 : i32
    %c0_i32_1 = arith.constant 0 : i32
    return %c0_i32, %c0_i32_0 : i32, i32
  }
  func.func @transform_6(%arg0: i32) -> (i32, i32) {
    %c0_i32 = arith.constant 0 : i32
    %c0_i32_0 = arith.constant 0 : i32
    %c0_i32_1 = arith.constant 0 : i32
    return %c0_i32, %c0_i32_0 : i32, i32
  }
  func.func @transform_7(%arg0: i32) -> (i32, i32) {
    %c0_i32 = arith.constant 0 : i32
    %c0_i32_0 = arith.constant 0 : i32
    return %c0_i32, %arg0 : i32, i32
  }
}

</mosaic_0001>

<bundles_post_ra>
// kernel: tpu_custom_call.1
= control target key start
LH: loop header
LB: loop body
LE: loop exit
PB: predicated region body
PF: predicated region fallthrough
CT: control target
= control target key end

     0   :  { %v356_v1 = vmov 0.0   ;;  %vm46_vm0 = vcmask 130048   ;;  %vm357_vm1 = vmmov 0   ;;  %s432_s0 = inlined_call_operand.vmem [shape: f32[8,16], index: 0, kind: input, shape index: {}]   ;;  %s433_s1 = inlined_call_operand.vmem [shape: bf16[16,64], index: 1, kind: input, shape index: {}]   ;;  %s434_s2 = inlined_call_operand.vmem [shape: f32[1,64], index: 2, kind: input, shape index: {}]   ;;  %s435_s3 = inlined_call_operand.vmem [shape: bf16[64,32], index: 3, kind: input, shape index: {}]   ;;  %s436_s4 = inlined_call_operand.vmem [shape: f32[1,32], index: 4, kind: input, shape index: {}]   ;;  %s437_s5 = inlined_call_operand.vmem [shape: f32[1,32], index: 5, kind: input, shape index: {}]   ;;  %s438_s6 = inlined_call_operand.<no memory space> [shape: f32[1,1], index: 6, kind: input, shape index: {}]   ;;  %s439_s7 = inlined_call_operand.hbm [shape: f32[1,8], index: 7, kind: output, shape index: {}]  }
   0x1   :  { %v325_v0 = vld [vmem:[%s433_s1] sm:$0xff]   ;;  %299 = vmatprep.subr.bf16.mxu0 %v356_v1  ;;  %305 = vmatprep.subr.bf16.mxu1 %v356_v1  ;;  %v326_v3 = vld [vmem:[%s435_s3 + $0x18] sm:$0xff]   ;;  %v327_v5 = vld [vmem:[%s435_s3 + $0x10] sm:$0xff]  }
   0x2   :  { %v29_v2 = vld [vmem:[%s432_s0] sm:$0xff]  ;;  %300 = vmatpush3.bf16.msra.mxu0 %v325_v0  ;;  %301 = vmatprep.mubr.msk.bf16.mxu0 %vm357_vm1, %v356_v1 }
   0x3   :  { %v30_v4 = vpack.c.bf16 %v29_v2, %v29_v2  ;;  %306 = vmatpush3.bf16.msra.mxu1 %v326_v3  ;;  %313 = vmatprep.mubr.msk.bf16.mxu1 %vm357_vm1, %v356_v1 }
   0x4   :  { %307 = vmatprep.subr.bf16.mxu1 %v356_v1  ;;  %317 = vmatprep.subr.mxu0 %v356_v1 }
   0x5   :  { %302 = vmatmul.mubr.msk.bf16.vlgmr.msra.gmra.mxu0 %vm46_vm0, %v30_v4 }
   0x6   :  { %13 = vsyncpa [#allocation4], 0  ;;  %319 = vmatprep.mubr.msk.f32.mxu0 %vm357_vm1, %v356_v1  ;;  %v328_v6 = vld [vmem:[%s435_s3 + $0x8] sm:$0xff]   ;;  %v329_v7 = vld [vmem:[%s435_s3] sm:$0xff]   ;;  %vm131_vm2 = vcmask 523264   ;;  %vm179_vm3 = vcmask 261120   ;;  %v178_v24 = vstv %s438_s6 }
   0x7   :  { %308 = vmatpush3.bf16.msra.mxu1 %v327_v5  ;;  %v278_v8 = vld [vmem:[%s434_s2] ss:$0 sm:$0xff]  ;;  %vm262_vm4 = vcmask 57344  }
   0x8   :  { %309 = vmatprep.subr.bf16.mxu1 %v356_v1  ;;  %v281_v16 = vld [vmem:[%s436_s4] ss:$0 sm:$0xff]  ;;  %s358_s4 = smov [#allocation3]  }
   0x9   :  { %v176_v22 = vld [vmem:[%s437_s5] sm:$0x1]  ;;  %s270_s17 = sshll.u32 %s358_s4, 4  ;;  %s271_s17 = int_to_ptr.vmem [resolvable:$true] %s270_s17 }
   0xa   :  { %s334_s5 = scalar_lea.vmem %s271_s17, 16  ;;  %s338_s18 = scalar_lea.vmem %s271_s17, 32 }
   0xb   :  { %310 = vmatpush3.bf16.msra.mxu1 %v328_v6  ;;  %p335_p0 = scmp.ne.s32.totalorder %s271_s17, %s334_s5  ;;  %p339_p1 = scmp.lt.s32.totalorder %s271_s17, %s271_s17 }
   0xc   :  { %311 = vmatprep.subr.bf16.mxu1 %v356_v1  ;;  %p340_p2 = scmp.lt.s32.totalorder %s338_s18, %s334_s5 }
   0xe   :  { %p341_p3 = por %p340_p2, %p339_p1 }
   0xf   :  { %312 = vmatpush3.bf16.msra.mxu1 %v329_v7 }
  0x10   :  { %p342_p4 = pnand %p341_p3, %p335_p0 }
  0xc5   :  { %v84_v9 = vpop.f32.mrf.mxu0 }
  0xc6   :  { %v85_v10 = vadd.f32 %v278_v8, %v84_v9 }
  0xc7   :  { %v303_v11 = vpop.f32.mrf.mxu0 }
  0xc8   :  { %v90_v12 = vmax.f32 %v85_v10, 0.0 }
  0xc9   :  { %v87_v13 = vpop.f32.mrf.mxu0 }
  0xca   :  { %v91_v14 = vpack.c.bf16 %v90_v12, %v90_v12 }
  0xcb   :  { %v304_v15 = vpop.f32.mrf.mxu0 }
  0xcc   :  { %314 = vmatmul.mubr.msk.bf16.vlgmr.msra.gmra.mxu1 %vm131_vm2, %v91_v14 }
 0x18c   :  { %v169_v17 = vpop.f32.mrf.mxu1 }
 0x18d   :  { %v170_v18 = vadd.f32 %v281_v16, %v169_v17 }
 0x18e   :  { %v315_v19 = vpop.f32.mrf.mxu1 }
 0x18f   :  { %v175_v20 = vmax.f32 %v170_v18, 0.0 }
 0x190   :  { %v172_v21 = vpop.f32.mrf.mxu1 }
 0x191   :  { %318 = vmatpush3.xpose.msk.msra.mxu0 %vm179_vm3, %v175_v20 }
 0x192   :  { %v316_v23 = vpop.f32.mrf.mxu1 }
 0x194   :  { %320 = vmatmul.mubr.msk.f32.vlgmr.msra.gmra.mxu0 %vm179_vm3, %v176_v22 }
 0x254   :  { %v252_v25 = vpop.f32.mrf.mxu0 }
 0x255   :  { %v253_v26 = vadd.f32 %v252_v25, %v178_v24 }
 0x256   :  { %v321_v27 = vpop.f32.mrf.mxu0 }
 0x257   :  { %v289_v28 = vmul.f32 -1.442695, %v253_v26 }
 0x259   :  { %330 = vpow2.f32 %v289_v28 }
 0x266   :  { %v331_v29 = vpop.eup %330 }
 0x267   :  { %v259_v30 = vadd.f32 1.0, %v331_v29 }
 0x269   :  { %332 = vrcp.f32 %v259_v30 }
 0x276   :  { %v333_v31 = vpop.eup %332 }
 0x277   :  { %263 = vst.msk [vmem:[#allocation3] sm:$0x1] %vm262_vm4, %v333_v31 }
 0x278   :  { %345 = shalt.err (!%p342_p4)
}
 0x279   :  { %273 = dma.vmem_to_hbm [thread:$0]  %s271_s17, 16, %s439_s7, [#allocation4]  }
 0x27a   :  { %354 = dma.done.wait [#allocation4], 16  }
 0x27b   :  { %355 = vsyncadd [#allocation4], 4294967280 }
 0x27c   :  { %277 = vsyncpa [#allocation4], 1 }

</bundles_post_ra>
